<compile_context>
chip_gen: v7x
topology: tpu7x:2x2x1
jax: 0.10.0
libtpu: 0.0.40
codegen_flags: <defaults>
</compile_context>

<pallas_src>
import functools
import math

import jax
import jax.numpy as jnp
from jax.experimental import pallas as pl
from jax.experimental.pallas import tpu as pltpu


# ---------------------------------------------------------------------------
# Kernel bodies
# ---------------------------------------------------------------------------

def _attention_core(q, k, v, out_ref, attn_ref, *, tb, seq):
    """Scaled dot-product attention on already-projected q/k/v.

    The 1/sqrt(d_k) scale is pre-folded into the q projection weights.
    """
    d_k = q.shape[-1]
    d_v = v.shape[-1]
    # The wrapper guarantees seq (and tb*seq) stay 8-sublane aligned so these
    # reshapes do not split (8,128) tiles.
    q3 = q.reshape(tb, seq, d_k)
    k3 = k.reshape(tb, seq, d_k)
    v3 = v.reshape(tb, seq, d_v)

    # Batched QK^T contracting the last dims directly — no explicit K
    # transpose (no XLU pass, no materialized k.T).
    scores = jnp.einsum('bqd,bkd->bqk', q3, k3,
                        preferred_element_type=jnp.float32)        # [tb, S, S]

    # Numerically stable softmax.
    m = jnp.max(scores, axis=-1, keepdims=True)
    e = jnp.exp(scores - m)
    denom = jnp.sum(e, axis=-1, keepdims=True)

    if attn_ref is not None:
        # Attention weights are a module output: use the exact divide so rows
        # sum to 1 (torch.softmax semantics), not the approx EUP reciprocal.
        p = e / denom
    else:
        # Output-only path: approx reciprocal runs in the EUP slot for free.
        p = e * pl.reciprocal(denom, approx=True)

    # Probabilities @ V in f32 (MXU, f32 accumulation). bf16 casts were pure
    # overhead at these sizes.
    out = jnp.einsum('bqk,bkd->bqd', p, v3,
                     preferred_element_type=jnp.float32)           # [tb, S, d_v]

    out_ref[...] = out.reshape(tb * seq, d_v).astype(out_ref.dtype)
    if attn_ref is not None:
        attn_ref[...] = p.astype(attn_ref.dtype)


def _head_fused_kernel(x_ref, w_ref, b_ref, out_ref, attn_ref=None,
                       *, tb, seq, d_k, d_v):
    """Self-attention fast path: one input stream, one fused QKV projection."""
    proj = jnp.dot(x_ref[...], w_ref[...],
                   preferred_element_type=jnp.float32) + b_ref[...]
    q = proj[:, :d_k]
    k = proj[:, d_k:2 * d_k]
    v = proj[:, 2 * d_k:2 * d_k + d_v]
    _attention_core(q, k, v, out_ref, attn_ref, tb=tb, seq=seq)


def _head_kernel(xq_ref, xk_ref, xv_ref,
                 wq_ref, bq_ref, wk_ref, bk_ref, wv_ref, bv_ref,
                 out_ref, attn_ref=None, *, tb, seq):
    """General path: distinct query / key / value input streams."""
    q = jnp.dot(xq_ref[...], wq_ref[...],
                preferred_element_type=jnp.float32) + bq_ref[...]
    k = jnp.dot(xk_ref[...], wk_ref[...],
                preferred_element_type=jnp.float32) + bk_ref[...]
    v = jnp.dot(xv_ref[...], wv_ref[...],
                preferred_element_type=jnp.float32) + bv_ref[...]
    _attention_core(q, k, v, out_ref, attn_ref, tb=tb, seq=seq)


# ---------------------------------------------------------------------------
# Block-size selection (generation-aware)
# ---------------------------------------------------------------------------

def _vmem_footprint_bytes(tb, S, d_model, d_k, d_v, n_inputs, with_weights):
    """Conservative per-step VMEM estimate: double-buffered pipeline blocks
    plus live temporaries, with last dims padded to the 128-lane tile."""
    rows = tb * S
    lane = lambda n: max(n, 128)
    f32 = 4
    proj_w = 2 * d_k + d_v
    inputs = 2 * n_inputs * rows * lane(d_model) * f32      # double-buffered
    outputs = 2 * rows * lane(d_v) * f32
    if with_weights:
        outputs += 2 * tb * S * lane(S) * f32
    weights = 2 * (d_model * lane(proj_w) + lane(proj_w)) * f32
    temps = (rows * lane(proj_w) * f32                      # projections
             + 3 * tb * S * lane(S) * f32                   # scores / e / p
             + rows * lane(d_v) * f32)                      # out accumulator
    return inputs + outputs + weights + temps


def _choose_block_b(B, S, d_model, d_k, d_v, n_inputs, with_weights,
                    vmem_budget_bytes=24 << 20):
    """Pick how many batch elements to process per grid step.

      * (block_b*S) % 8 == 0 (or full extent) so BlockSpecs lower cleanly;
      * fits a v7x-safe VMEM budget (64 MiB chip / 32 MiB default scope);
      * leaves the grid with >= 2 steps so the "parallel" batch axis can
        shard across v7x's two TensorCores;
      * prefers MXU-friendly M: rows % 256 == 0 (v6e/v7x), then % 128 (v5e),
        then largest rows.
    """
    footprint = lambda c: _vmem_footprint_bytes(
        c, S, d_model, d_k, d_v, n_inputs, with_weights)
    divisors = [c for c in range(1, B + 1) if B % c == 0]
    aligned = [c for c in divisors if ((c * S) % 8 == 0) or c == B]
    valid = [c for c in aligned if footprint(c) <= vmem_budget_bytes]
    if not valid:
        valid = [min(aligned, key=footprint)]
    multi_step = [c for c in valid if B // c >= 2]
    cands = multi_step if multi_step else valid

    def score(c):
        rows = c * S
        return (rows % 256 == 0, rows % 128 == 0, rows)

    return max(cands, key=score)


# ---------------------------------------------------------------------------
# Wrapper
# ---------------------------------------------------------------------------

def head_forward(query, key, value, params, *, mask=None,
                 block_b=None, return_weights=True):
    """query/key/value: [B, S, d_model] float32.

    Returns (attn_output [B,S,d_v], attn_weights [B,S,S]) by default (module
    semantics), or just attn_output when return_weights=False (drops the
    O(B*S^2) f32 HBM writeback on perf paths).
    """
    assert mask is None, "mask path not implemented"  # TODO(synk): additive mask
    B, S, d_model = query.shape
    d_k = params["wq"].shape[1]
    d_v = params["wv"].shape[1]
    scale = 1.0 / math.sqrt(d_k)

    fused = (query is key) and (key is value)      # self-attention fast path
    n_inputs = 1 if fused else 3

    if block_b is None:
        block_b = _choose_block_b(B, S, d_model, d_k, d_v,
                                  n_inputs, return_weights)
    assert B % block_b == 0
    grid = (B // block_b,)
    rows = block_b * S

    # Outputs.
    out_specs = [pl.BlockSpec((rows, d_v), lambda i: (i, 0))]
    out_shape = [jax.ShapeDtypeStruct((B * S, d_v), jnp.float32)]
    if return_weights:
        out_specs.append(pl.BlockSpec((block_b, S, S), lambda i: (i, 0, 0)))
        out_shape.append(jax.ShapeDtypeStruct((B, S, S), jnp.float32))

    vmem_need = _vmem_footprint_bytes(block_b, S, d_model, d_k, d_v,
                                      n_inputs, return_weights)
    compiler_params = pltpu.CompilerParams(
        dimension_semantics=("parallel",),          # shard batch blocks on v7x
        vmem_limit_bytes=int(min(48 << 20, max(2 * vmem_need, 32 << 20))),
    )

    if fused:
        # Fold 1/sqrt(d_k) into Wq/bq and concatenate the three projections
        # into one [d_model, 2*d_k + d_v] matrix: one input stream, one MXU
        # matmul per block instead of three.
        w_qkv = jnp.concatenate(
            [params["wq"] * scale, params["wk"], params["wv"]], axis=1)
        b_qkv = jnp.concatenate(
            [params["bq"] * scale, params["bk"], params["bv"]], axis=1)
        x2 = query.reshape(B * S, d_model)
        kernel = functools.partial(_head_fused_kernel, tb=block_b, seq=S,
                                   d_k=d_k, d_v=d_v)
        in_specs = [
            pl.BlockSpec((rows, d_model), lambda i: (i, 0)),
            pl.BlockSpec((d_model, 2 * d_k + d_v), lambda i: (0, 0)),
            pl.BlockSpec((1, 2 * d_k + d_v), lambda i: (0, 0)),
        ]
        args = (x2, w_qkv, b_qkv)
    else:
        # General path: three input streams, scale still folded into Wq/bq.
        q2 = query.reshape(B * S, d_model)
        k2 = key.reshape(B * S, d_model)
        v2 = value.reshape(B * S, d_model)
        kernel = functools.partial(_head_kernel, tb=block_b, seq=S)
        flat_in_spec = pl.BlockSpec((rows, d_model), lambda i: (i, 0))
        weight_spec = lambda n: pl.BlockSpec((d_model, n), lambda i: (0, 0))
        bias_spec = lambda n: pl.BlockSpec((1, n), lambda i: (0, 0))
        in_specs = [
            flat_in_spec, flat_in_spec, flat_in_spec,
            weight_spec(d_k), bias_spec(d_k),
            weight_spec(d_k), bias_spec(d_k),
            weight_spec(d_v), bias_spec(d_v),
        ]
        args = (q2, k2, v2,
                params["wq"] * scale, params["bq"] * scale,
                params["wk"], params["bk"],
                params["wv"], params["bv"])

    results = pl.pallas_call(
        kernel,
        out_shape=tuple(out_shape),
        grid_spec=pltpu.PrefetchScalarGridSpec(
            num_scalar_prefetch=0,
            grid=grid,
            in_specs=in_specs,
            out_specs=out_specs,
        ),
        compiler_params=compiler_params,
    )(*args)

    if return_weights:
        out2d, attn_w = results
        return out2d.reshape(B, S, d_v), attn_w
    (out2d,) = results
    return out2d.reshape(B, S, d_v)


# ---------------------------------------------------------------------------
# Params / reference
# ---------------------------------------------------------------------------

def init_head_params(key, d_model, d_k, d_v):
    """Deterministic synthetic parameters (PyTorch Linear-like uniform init)."""
    ks = jax.random.split(key, 6)
    bound = 1.0 / math.sqrt(d_model)
    u = lambda k, shape: jax.random.uniform(k, shape, jnp.float32, -bound, bound)
    return {
        "wq": u(ks[0], (d_model, d_k)), "bq": u(ks[1], (1, d_k)),
        "wk": u(ks[2], (d_model, d_k)), "bk": u(ks[3], (1, d_k)),
        "wv": u(ks[4], (d_model, d_v)), "bv": u(ks[5], (1, d_v)),
    }


def head_reference(query, key, value, params):
    q = query @ params["wq"] + params["bq"]
    k = key @ params["wk"] + params["bk"]
    v = value @ params["wv"] + params["bv"]
    scores = jnp.einsum("bqd,bkd->bqk", q, k) / math.sqrt(q.shape[-1])
    w = jax.nn.softmax(scores, axis=-1)
    return jnp.einsum("bqk,bkd->bqd", w, v), w


if __name__ == "__main__":
    B, S, d_model, d_k, d_v = 2, 8, 32, 16, 16

    root = jax.random.PRNGKey(0)
    k_param, k_q, k_k, k_v = jax.random.split(root, 4)

    params = init_head_params(k_param, d_model, d_k, d_v)
    query = jax.random.normal(k_q, (B, S, d_model), jnp.float32)
    key_in = jax.random.normal(k_k, (B, S, d_model), jnp.float32)
    value = jax.random.normal(k_v, (B, S, d_model), jnp.float32)

    # General path: distinct query / key / value streams.
    attn_out, attn_w = head_forward(query, key_in, value, params)
    jax.block_until_ready((attn_out, attn_w))
    ref_out, ref_w = head_reference(query, key_in, value, params)
    assert attn_out.shape == (B, S, d_v) and attn_w.shape == (B, S, S)
    assert jnp.allclose(attn_w, ref_w, atol=5e-3, rtol=5e-3)
    assert jnp.allclose(attn_out, ref_out, atol=1e-2, rtol=1e-2)

    # Fused-QKV self-attention fast path (query is key is value).
    sa_out, sa_w = head_forward(query, query, query, params)
    jax.block_until_ready((sa_out, sa_w))
    ref_sa_out, ref_sa_w = head_reference(query, query, query, params)
    assert sa_out.shape == (B, S, d_v) and sa_w.shape == (B, S, S)
    assert jnp.allclose(sa_w, ref_sa_w, atol=5e-3, rtol=5e-3)
    assert jnp.allclose(sa_out, ref_sa_out, atol=1e-2, rtol=1e-2)

    print("KERNEL_OK")
</pallas_src>

<mosaic_0001>
module attributes {stable_mosaic.version = 11 : i64} {
  func.func @_head_kernel(%arg0: i32, %arg1: memref<8x32xf32, #tpu.memory_space<vmem>>, %arg2: memref<8x32xf32, #tpu.memory_space<vmem>>, %arg3: memref<8x32xf32, #tpu.memory_space<vmem>>, %arg4: memref<32x16xf32, #tpu.memory_space<vmem>>, %arg5: memref<1x16xf32, #tpu.memory_space<vmem>>, %arg6: memref<32x16xf32, #tpu.memory_space<vmem>>, %arg7: memref<1x16xf32, #tpu.memory_space<vmem>>, %arg8: memref<32x16xf32, #tpu.memory_space<vmem>>, %arg9: memref<1x16xf32, #tpu.memory_space<vmem>>, %arg10: memref<8x16xf32, #tpu.memory_space<vmem>>, %arg11: memref<1x8x8xf32, #tpu.memory_space<vmem>>) attributes {dimension_semantics = [#tpu.dimension_semantics<parallel>], iteration_bounds = array<i64: 2>, scalar_prefetch = 0 : i64, scratch_operands = 0 : i64, tpu.core_type = #tpu.core_type<tc>, window_params = [{transform_indices = @transform_0, window_bounds = array<i64: 8, 32>}, {transform_indices = @transform_1, window_bounds = array<i64: 8, 32>}, {transform_indices = @transform_2, window_bounds = array<i64: 8, 32>}, {pipeline_mode = #tpu.pipeline_mode<synchronous>, transform_indices = @transform_3, window_bounds = array<i64: 32, 16>}, {pipeline_mode = #tpu.pipeline_mode<synchronous>, transform_indices = @transform_4, window_bounds = array<i64: 1, 16>}, {pipeline_mode = #tpu.pipeline_mode<synchronous>, transform_indices = @transform_5, window_bounds = array<i64: 32, 16>}, {pipeline_mode = #tpu.pipeline_mode<synchronous>, transform_indices = @transform_6, window_bounds = array<i64: 1, 16>}, {pipeline_mode = #tpu.pipeline_mode<synchronous>, transform_indices = @transform_7, window_bounds = array<i64: 32, 16>}, {pipeline_mode = #tpu.pipeline_mode<synchronous>, transform_indices = @transform_8, window_bounds = array<i64: 1, 16>}, {transform_indices = @transform_9, window_bounds = array<i64: 8, 16>}, {transform_indices = @transform_10, window_bounds = array<i64: 1, 8, 8>}]} {
    %c0 = arith.constant 0 : index
    %c0_0 = arith.constant 0 : index
    %0 = vector.load %arg1[%c0, %c0_0] : memref<8x32xf32, #tpu.memory_space<vmem>>, vector<8x32xf32>
    %c0_1 = arith.constant 0 : index
    %c0_2 = arith.constant 0 : index
    %1 = vector.load %arg4[%c0_1, %c0_2] : memref<32x16xf32, #tpu.memory_space<vmem>>, vector<32x16xf32>
    %cst = arith.constant dense<0.000000e+00> : vector<8x16xf32>
    %2 = tpu.matmul %0, %1, %cst {dimension_numbers = #tpu.dot_dimension_numbers<[1], [0], [0], [1], [0, 0, 1, 1], [], []>} : vector<8x32xf32>, vector<32x16xf32>, vector<8x16xf32> -> vector<8x16xf32>
    %c0_3 = arith.constant 0 : index
    %c0_4 = arith.constant 0 : index
    %3 = vector.load %arg5[%c0_3, %c0_4] : memref<1x16xf32, #tpu.memory_space<vmem>>, vector<1x16xf32>
    %4 = vector.broadcast %3 : vector<1x16xf32> to vector<8x16xf32>
    %5 = arith.addf %2, %4 : vector<8x16xf32>
    %c0_5 = arith.constant 0 : index
    %c0_6 = arith.constant 0 : index
    %6 = vector.load %arg2[%c0_5, %c0_6] : memref<8x32xf32, #tpu.memory_space<vmem>>, vector<8x32xf32>
    %c0_7 = arith.constant 0 : index
    %c0_8 = arith.constant 0 : index
    %7 = vector.load %arg6[%c0_7, %c0_8] : memref<32x16xf32, #tpu.memory_space<vmem>>, vector<32x16xf32>
    %cst_9 = arith.constant dense<0.000000e+00> : vector<8x16xf32>
    %8 = tpu.matmul %6, %7, %cst_9 {dimension_numbers = #tpu.dot_dimension_numbers<[1], [0], [0], [1], [0, 0, 1, 1], [], []>} : vector<8x32xf32>, vector<32x16xf32>, vector<8x16xf32> -> vector<8x16xf32>
    %c0_10 = arith.constant 0 : index
    %c0_11 = arith.constant 0 : index
    %9 = vector.load %arg7[%c0_10, %c0_11] : memref<1x16xf32, #tpu.memory_space<vmem>>, vector<1x16xf32>
    %10 = vector.broadcast %9 : vector<1x16xf32> to vector<8x16xf32>
    %11 = arith.addf %8, %10 : vector<8x16xf32>
    %c0_12 = arith.constant 0 : index
    %c0_13 = arith.constant 0 : index
    %12 = vector.load %arg3[%c0_12, %c0_13] : memref<8x32xf32, #tpu.memory_space<vmem>>, vector<8x32xf32>
    %c0_14 = arith.constant 0 : index
    %c0_15 = arith.constant 0 : index
    %13 = vector.load %arg8[%c0_14, %c0_15] : memref<32x16xf32, #tpu.memory_space<vmem>>, vector<32x16xf32>
    %cst_16 = arith.constant dense<0.000000e+00> : vector<8x16xf32>
    %14 = tpu.matmul %12, %13, %cst_16 {dimension_numbers = #tpu.dot_dimension_numbers<[1], [0], [0], [1], [0, 0, 1, 1], [], []>} : vector<8x32xf32>, vector<32x16xf32>, vector<8x16xf32> -> vector<8x16xf32>
    %c0_17 = arith.constant 0 : index
    %c0_18 = arith.constant 0 : index
    %15 = vector.load %arg9[%c0_17, %c0_18] : memref<1x16xf32, #tpu.memory_space<vmem>>, vector<1x16xf32>
    %16 = vector.broadcast %15 : vector<1x16xf32> to vector<8x16xf32>
    %17 = arith.addf %14, %16 : vector<8x16xf32>
    %18 = vector.shape_cast %5 : vector<8x16xf32> to vector<1x8x16xf32>
    %19 = vector.shape_cast %11 : vector<8x16xf32> to vector<1x8x16xf32>
    %20 = vector.shape_cast %17 : vector<8x16xf32> to vector<1x8x16xf32>
    "tpu.trace_start"() <{level = 10 : i32, message = "bqd,bkd->bqk"}> : () -> ()
    %cst_19 = arith.constant dense<0.000000e+00> : vector<1x8x8xf32>
    %21 = tpu.matmul %18, %19, %cst_19 {dimension_numbers = #tpu.dot_dimension_numbers<[2], [2], [1], [1], [0, 0, 0, 1, 1, 1], [0], [0]>} : vector<1x8x16xf32>, vector<1x8x16xf32>, vector<1x8x8xf32> -> vector<1x8x8xf32>
    "tpu.trace_stop"() : () -> ()
    %cst_20 = arith.constant dense<0xFF800000> : vector<1x8xf32>
    %22 = vector.multi_reduction <maximumf>, %21, %cst_20 [2] : vector<1x8x8xf32> to vector<1x8xf32>
    %23 = vector.shape_cast %22 : vector<1x8xf32> to vector<1x8x1xf32>
    %24 = vector.broadcast %23 : vector<1x8x1xf32> to vector<1x8x8xf32>
    %25 = arith.subf %21, %24 : vector<1x8x8xf32>
    %26 = math.exp %25 : vector<1x8x8xf32>
    %cst_21 = arith.constant dense<0.000000e+00> : vector<1x8xf32>
    %27 = vector.multi_reduction <add>, %26, %cst_21 [2] : vector<1x8x8xf32> to vector<1x8xf32>
    %28 = vector.shape_cast %27 : vector<1x8xf32> to vector<1x8x1xf32>
    %29 = vector.broadcast %28 : vector<1x8x1xf32> to vector<1x8x8xf32>
    %30 = arith.divf %26, %29 : vector<1x8x8xf32>
    "tpu.trace_start"() <{level = 10 : i32, message = "bqk,bkd->bqd"}> : () -> ()
    %cst_22 = arith.constant dense<0.000000e+00> : vector<1x8x16xf32>
    %31 = tpu.matmul %30, %20, %cst_22 {dimension_numbers = #tpu.dot_dimension_numbers<[2], [1], [1], [2], [0, 0, 0, 1, 1, 2], [0], [0]>} : vector<1x8x8xf32>, vector<1x8x16xf32>, vector<1x8x16xf32> -> vector<1x8x16xf32>
    "tpu.trace_stop"() : () -> ()
    %32 = vector.shape_cast %31 : vector<1x8x16xf32> to vector<8x16xf32>
    %c0_23 = arith.constant 0 : index
    %c0_24 = arith.constant 0 : index
    %33 = vector.load %arg10[%c0_23, %c0_24] : memref<8x16xf32, #tpu.memory_space<vmem>>, vector<8x16xf32>
    tpu.vector_store %arg10[%c0_23, %c0_24], %32 {strides = array<i32>} : memref<8x16xf32, #tpu.memory_space<vmem>>, vector<8x16xf32>,
    %c0_25 = arith.constant 0 : index
    %c0_26 = arith.constant 0 : index
    %c0_27 = arith.constant 0 : index
    %34 = vector.load %arg11[%c0_25, %c0_26, %c0_27] : memref<1x8x8xf32, #tpu.memory_space<vmem>>, vector<1x8x8xf32>
    tpu.vector_store %arg11[%c0_25, %c0_26, %c0_27], %30 {strides = array<i32>} : memref<1x8x8xf32, #tpu.memory_space<vmem>>, vector<1x8x8xf32>,
    return
  }
  func.func @transform_0(%arg0: i32) -> (i32, i32) {
    %c0_i32 = arith.constant 0 : i32
    %c0_i32_0 = arith.constant 0 : i32
    return %arg0, %c0_i32 : i32, i32
  }
  func.func @transform_1(%arg0: i32) -> (i32, i32) {
    %c0_i32 = arith.constant 0 : i32
    %c0_i32_0 = arith.constant 0 : i32
    return %arg0, %c0_i32 : i32, i32
  }
  func.func @transform_2(%arg0: i32) -> (i32, i32) {
    %c0_i32 = arith.constant 0 : i32
    %c0_i32_0 = arith.constant 0 : i32
    return %arg0, %c0_i32 : i32, i32
  }
  func.func @transform_3(%arg0: i32) -> (i32, i32) {
    %c0_i32 = arith.constant 0 : i32
    %c0_i32_0 = arith.constant 0 : i32
    %c0_i32_1 = arith.constant 0 : i32
    return %c0_i32, %c0_i32_0 : i32, i32
  }
  func.func @transform_4(%arg0: i32) -> (i32, i32) {
    %c0_i32 = arith.constant 0 : i32
    %c0_i32_0 = arith.constant 0 : i32
    %c0_i32_1 = arith.constant 0 : i32
    return %c0_i32, %c0_i32_0 : i32, i32
  }
  func.func @transform_5(%arg0: i32) -> (i32, i32) {
    %c0_i32 = arith.constant 0 : i32
    %c0_i32_0 = arith.constant 0 : i32
    %c0_i32_1 = arith.constant 0 : i32
    return %c0_i32, %c0_i32_0 : i32, i32
  }
  func.func @transform_6(%arg0: i32) -> (i32, i32) {
    %c0_i32 = arith.constant 0 : i32
    %c0_i32_0 = arith.constant 0 : i32
    %c0_i32_1 = arith.constant 0 : i32
    return %c0_i32, %c0_i32_0 : i32, i32
  }
  func.func @transform_7(%arg0: i32) -> (i32, i32) {
    %c0_i32 = arith.constant 0 : i32
    %c0_i32_0 = arith.constant 0 : i32
    %c0_i32_1 = arith.constant 0 : i32
    return %c0_i32, %c0_i32_0 : i32, i32
  }
  func.func @transform_8(%arg0: i32) -> (i32, i32) {
    %c0_i32 = arith.constant 0 : i32
    %c0_i32_0 = arith.constant 0 : i32
    %c0_i32_1 = arith.constant 0 : i32
    return %c0_i32, %c0_i32_0 : i32, i32
  }
  func.func @transform_9(%arg0: i32) -> (i32, i32) {
    %c0_i32 = arith.constant 0 : i32
    %c0_i32_0 = arith.constant 0 : i32
    return %arg0, %c0_i32 : i32, i32
  }
  func.func @transform_10(%arg0: i32) -> (i32, i32, i32) {
    %c0_i32 = arith.constant 0 : i32
    %c0_i32_0 = arith.constant 0 : i32
    %c0_i32_1 = arith.constant 0 : i32
    return %arg0, %c0_i32, %c0_i32_0 : i32, i32, i32
  }
}

</mosaic_0001>

<bundles_post_ra>
// kernel: tpu_custom_call.1
= control target key start
LH: loop header
LB: loop body
LE: loop exit
PB: predicated region body
PF: predicated region fallthrough
CT: control target
= control target key end

     0   :  { %s1484_s0 = inlined_call_operand.vmem [shape: f32[16,32], index: 0, kind: input, shape index: {}]   ;;  %s1485_s1 = inlined_call_operand.vmem [shape: f32[16,32], index: 1, kind: input, shape index: {}]   ;;  %s1486_s2 = inlined_call_operand.vmem [shape: f32[16,32], index: 2, kind: input, shape index: {}]   ;;  %s1487_s3 = inlined_call_operand.vmem [shape: f32[32,16], index: 3, kind: input, shape index: {}]   ;;  %s1488_s4 = inlined_call_operand.vmem [shape: f32[1,16], index: 4, kind: input, shape index: {}]   ;;  %s1489_s5 = inlined_call_operand.vmem [shape: f32[32,16], index: 5, kind: input, shape index: {}]   ;;  %s1490_s6 = inlined_call_operand.vmem [shape: f32[1,16], index: 6, kind: input, shape index: {}]   ;;  %s1491_s7 = inlined_call_operand.vmem [shape: f32[32,16], index: 7, kind: input, shape index: {}]   ;;  %s1492_s8 = inlined_call_operand.vmem [shape: f32[1,16], index: 8, kind: input, shape index: {}]   ;;  %s1493_s9 = inlined_call_operand.hbm [shape: f32[16,16], index: 9, kind: output, shape index: {0}]   ;;  %s1494_s10 = inlined_call_operand.hbm [shape: f32[2,8,8], index: 10, kind: output, shape index: {1}]  }
   0x1   :  { %1497 = sst [smem:[#allocation8_spill]] %s1484_s0 }
   0x2   :  { %16 = vsyncpa [#allocation3], 0 }
   0x3   :  { %18 = vsyncpa [#allocation3 + $0x1], 0 }
   0x4   :  { %19 = vsyncpa [#allocation5], 0 }
   0x5   :  { %21 = vsyncpa [#allocation5 + $0x1], 0  ;;  %s1278_s13 = smov 0   ;;  %s1280_s14 = smov 0  }
   0x6   :  { %s1282_s15 = smov 0   ;;  %s1284_s16 = smov 0  }
   0x7 LB: > { %s1299_s17 = sadd.s32 4294967295, %s1216_s16   ;;  %s967_s18 = sadd.s32 4294967294, %s1216_s16   ;;  %s1216_s16 = sphi %s1284_s16, %s1506_s16   ;;  %s1212_s15 = sphi %s1282_s15, %s1505_s15   ;;  %s1208_s14 = sphi %s1280_s14, %s1504_s14   ;;  %s1204_s13 = sphi %s1278_s13, %s1503_s13  }
   0x8   : > { %s1303_s19 = sadd.s32 1, %s1216_s16   ;;  %s238_s20 = sadd.s32 1, %s1212_s15 }
   0x9   : > { %s235_s21 = ssub.s32 %s1216_s16, %s1303_s19  ;;  %p248_p0 = scmp.ne.s32.totalorder %s1212_s15, %s1208_s14 }
   0xa   : > { %p236_p1 = scmp.eq.s32.totalorder %s235_s21, 0  ;;  %p249_p2 = scmp.eq.s32.totalorder %s1299_s17, 1 }
   0xb   : > { %p254_p3 = scmp.ne.s32.totalorder %s1208_s14, %s1204_s13  ;;  %p255_p4 = scmp.eq.s32.totalorder %s967_s18, 1 }
   0xc   : > { %s1314_s22 = scalar_select %p236_p1, %s1212_s15, %s238_s20  }
   0xd   : > { %p1316_p5 = por %p249_p2, %p248_p0  ;;  %p1320_p6 = por %p255_p4, %p254_p3 }
   0xe   : > { %p970_p7 = scmp.ge.s32.totalorder %s1216_s16, 1  ;;  %p338_p8 = scmp.lt.s32.totalorder %s1216_s16, 3 }
  0x10   : > { %p339_p9 = pnand %p970_p7, %p338_p8 }
  0x11   : > { %v487_v0 = vld [vmem:[%s1489_s5] sm:$0xff] (!%p339_p9)  ;;  %v488_v1 = vld [vmem:[%s1489_s5 + $0x8] sm:$0xff] (!%p339_p9)  ;;  %v1218_v3 = vmov (!%p339_p9), 0.0|0.0   ;;  %v489_v6 = vld [vmem:[%s1489_s5 + $0x10] sm:$0xff] (!%p339_p9)  ;;  %p388_p10 = scmp.lt.s32.totalorder (!%p339_p9), %s1299_s17, 1  ;;  %vm1219_vm0 = vmmov (!%p339_p9), 0  }
  0x12   : > { %342 = sbr.rel (%p339_p9) target bundleno = 999 (0x3e7), region = 56  ;;  %v401_v2 = vld [vmem:[%s1487_s3] sm:$0xff] (!%p339_p9)  ;;  %1059 = vmatprep.subr.bf16.mxu1 (!%p339_p9), %v1218_v3  ;;  %v1060_v4 = vpack.c.bf16 (!%p339_p9), %v488_v1, %v487_v0  ;;  %1053 = vmatprep.subr.bf16.mxu0 (!%p339_p9), %v1218_v3  ;;  %v402_v5 = vld [vmem:[%s1487_s3 + $0x8] sm:$0xff] (!%p339_p9)  ;;  %v490_v7 = vld [vmem:[%s1489_s5 + $0x18] sm:$0xff] (!%p339_p9)  ;;  %v1220_v9 = vmov (!%p339_p9), 0.0   ;;  %s1500_s0 = sld [smem:[#allocation8_spill]] (!%p339_p9) }
  0x13   : > { %v1054_v8 = vpack.c.bf16 (!%p339_p9), %v402_v5, %v401_v2  ;;  %1029 = vmatprep.mubr.msk.f32.mxu1 (!%p339_p9), %vm1219_vm0, %v1220_v9  ;;  %v403_v10 = vld [vmem:[%s1487_s3 + $0x10] sm:$0xff] (!%p339_p9)  ;;  %v404_v11 = vld [vmem:[%s1487_s3 + $0x18] sm:$0xff] (!%p339_p9)  ;;  %1018 = vmatprep.mubr.msk.f32.mxu0 (!%p339_p9), %vm1219_vm0, %v1220_v9  ;;  %v1063_v12 = vpack.c.bf16 (!%p339_p9), %v490_v7, %v489_v6  ;;  %vm412_vm1 = vcmask (!%p339_p9), 261120   ;;  %v978_v16 = vld [vmem:[%s1490_s6] ss:$0 sm:$0xff] (!%p339_p9)  ;;  %vm656_vm2 = vcmask (!%p339_p9), 130048  }
  0x14   : > { %1061 = vmatpush3.bf16.msra.mxu1 (!%p339_p9), %v1060_v4  ;;  %v1057_v13 = vpack.c.bf16 (!%p339_p9), %v404_v11, %v403_v10  ;;  %v976_v17 = vld [vmem:[%s1488_s4] ss:$0 sm:$0xff] (!%p339_p9)  ;;  %v573_v25 = vld [vmem:[%s1491_s7 + $0x8] sm:$0xff] (!%p339_p9)  ;;  %v574_v26 = vld [vmem:[%s1491_s7 + $0x10] sm:$0xff] (!%p339_p9)  ;;  %vm733_vm3 = vcmask (!%p339_p9), 64512   ;;  %s1221_s18 = smov (!%p339_p9), [#allocation4]  }
  0x15   : > { %1055 = vmatpush3.bf16.msra.mxu0 (!%p339_p9), %v1054_v8  ;;  %1062 = vmatprep.subr.bf16.mxu1 (!%p339_p9), %v1218_v3  ;;  %v572_v24 = vld [vmem:[%s1491_s7] sm:$0xff] (!%p339_p9)  ;;  %v575_v28 = vld [vmem:[%s1491_s7 + $0x18] sm:$0xff] (!%p339_p9) }
  0x16   : > { %1056 = vmatprep.subr.bf16.mxu0 (!%p339_p9), %v1218_v3  ;;  %v1066_v27 = vpack.c.bf16 (!%p339_p9), %v573_v25, %v572_v24  ;;  %v1069_v29 = vpack.c.bf16 (!%p339_p9), %v575_v28, %v574_v26  ;;  %v980_v40 = vld [vmem:[%s1492_s8] ss:$0 sm:$0xff] (!%p339_p9) }
  0x18   : > { %1064 = vmatpush3.bf16.msra.mxu1 (!%p339_p9), %v1063_v12 }
  0x19   : > { %s389_s30 = scalar_select %p388_p10, %s1299_s17, 1  ;;  %1058 = vmatpush3.bf16.msra.mxu0 %v1057_v13  ;;  %1043 = vmatprep.subr.mxu1 %v1220_v9 }
  0x1a   : > { %1065 = vmatprep.subr.bf16.mxu0 %v1218_v3 }
  0x1b   : > { %s1354_s11 = sshll.u32 %s389_s30, 3 }
  0x1c   : > { %s395_s20 = scalar_lea.vmem %s1485_s1, %s1354_s11  ;;  %s391_s26 = scalar_lea.vmem %s1500_s0, %s1354_s11 }
  0x1d   : > { %v486_v14 = vld [vmem:[%s395_s20] sm:$0xff]  ;;  %s399_s12 = scalar_lea.vmem %s1486_s2, %s1354_s11  ;;  %s1400_s20 = sand.u32 1, %s1208_s14  }
  0x1e   : > { %v400_v15 = vld [vmem:[%s391_s26] sm:$0xff]  ;;  %1030 = vmatmul.mubr.msk.f32.vlgmr.msra.gmra.mrb[0].mxu1 %vm412_vm1, %v486_v14  ;;  %s1495_s21 = sshll.u32 %s1400_s20, 3  ;;  %s1496_s26 = sshll.u32 %s1299_s17, 7 }
  0x1f   : > { %1019 = vmatmul.mubr.msk.f32.vlgmr.msra.gmra.mrb[0].mxu0 %vm412_vm1, %v400_v15  ;;  %1045 = vmatprep.mubr.msk.f32.mxu1 %vm1219_vm0, %v1220_v9  ;;  %v571_v30 = vld [vmem:[%s399_s12] sm:$0xff]  ;;  %s387_s25 = scalar_lea.vmem [#allocation4], %s1495_s21  ;;  %s1413_s29 = scalar_lea.hbm %s1494_s10, %s1496_s26 }
  0x20   : > { %1040 = vmatprep.mubr.msk.f32.mxu0 %vm1219_vm0, %v1220_v9  ;;  %1067 = vmatpush3.bf16.msra.mxu0 %v1066_v27  ;;  %s852_s30 = sshll.u32 %s387_s25, 4  ;;  %s826_s12 = scalar_lea.sflag [#allocation5], %s1400_s20  ;;  %s853_s30 = int_to_ptr.vmem [resolvable:$true] %s852_s30 }
  0x21   : > { %1068 = vmatprep.subr.bf16.mxu0 %v1218_v3  ;;  %s1122_s11 = scalar_lea.vmem %s853_s30, 128  ;;  %s1126_s0 = sshll.u32 %s1221_s18, 4  ;;  %s1127_s0 = int_to_ptr.vmem [resolvable:$false] %s1126_s0 }
  0x22   : > { %p1123_p11 = scmp.ne.s32.totalorder %s853_s30, %s1122_s11  ;;  %s1128_s21 = scalar_lea.vmem %s1127_s0, 256 }
  0x23   : > { %p1129_p0 = scmp.lt.s32.totalorder %s853_s30, %s1127_s0  ;;  %p1130_p1 = scmp.lt.s32.totalorder %s1128_s21, %s1122_s11 }
  0x24   : > { %1070 = vmatpush3.bf16.msra.mxu0 %v1069_v29  ;;  %p1124_p12 = pnand %p1123_p11, %p1316_p5 }
  0x25   : > { %p1131_p2 = por %p1130_p1, %p1129_p0 }
  0x26   : > { %p1125_p13 = pneg %p1124_p12 }
  0x27   : > { %1041 = vmatmul.mubr.msk.f32.vlgmr.msra.gmra.mrb[2].mxu0 %vm412_vm1, %v571_v30 }
  0x28   : > { %p1132_p3 = pnand %p1131_p2, %p1125_p13 }
  0xf1   : > { %v567_v18 = vpop.f32.mrb[0].mxu1 }
  0xf2   : > { %v568_v19 = vadd.f32 %v978_v16, %v567_v18  ;;  %v1031_v20 = vpop.f32.mrb[1].mxu1  ;;  %v482_v21 = vpop.f32.mrb[0].mxu0 }
  0xf3   : > { %v483_v22 = vadd.f32 %v976_v17, %v482_v21  ;;  %v1020_v23 = vpop.f32.mrb[1].mxu0 }
  0xf4   : > { %1044 = vmatpush3.xpose.msk.msra.mxu1 %vm656_vm2, %v568_v19 }
  0xf5   : > { %1048 = vmatprep.subr.mxu1 %v1220_v9 }
  0xf7   : > { %1046 = vmatmul.mubr.msk.f32.vlgmr.msra.gmra.mrb[2].mxu1 %vm656_vm2, %v483_v22 }
  0xf8   : > { %1050 = vmatprep.mubr.msk.f32.mxu1 %vm1219_vm0, %v1220_v9 }
  0xfa   : > { %v652_v39 = vpop.f32.mrb[2].mxu0 }
  0xfb   : > { %v1042_v41 = vpop.f32.mrb[3].mxu0  ;;  %v653_v42 = vadd.f32 %v980_v40, %v652_v39 }
  0xfd   : > { %1049 = vmatpush3.msra.mxu1 %v653_v42 }
 0x1ca   : > { %v729_v31 = vpop.f32.mrb[2].mxu1 }
 0x1cb   : > { %v1047_v32 = vpop.f32.mrb[3].mxu1  ;;  %v734_v33 = vsel %vm733_vm3, %v729_v31, -inf }
 0x1cc   : > { %735 = vmax.xlane.f32.xlu0 %v734_v33 }
 0x259   : > { %v736_v34 = vpop.xlane.xlu0 %735 }
 0x25a   : > { %v737_v35 = vsub.f32 %v729_v31, %v736_v34 }
 0x25c   : > { %v738_v36 = vmul.f32 1.442695, %v737_v35 }
 0x25e   : > { %1118 = vpow2.f32 %v738_v36 }
 0x268   : > { %v1119_v37 = vpop.eup %1118 }
 0x269   : > { %v740_v38 = vsel %vm733_vm3, %v1119_v37, 0.0 }
 0x26a   : > { %741 = vadd.xlane.f32.xlu0 %v740_v38 }
 0x2f7   : > { %v742_v43 = vpop.xlane.xlu0 %741 }
 0x2f8   : > { %1120 = vrcp.f32 %v742_v43 }
 0x302   : > { %v1121_v44 = vpop.eup %1120 }
 0x303   : > { %v744_v45 = vmul.f32 %v1121_v44, %v1119_v37 }
 0x305   : > { %1051 = vmatmul.mubr.msk.f32.vlgmr.msra.gmra.mrb[4].mxu1 %vm733_vm3, %v744_v45  ;;  %819 = vst.msk [vmem:[%s387_s25] sm:$0xff] %vm733_vm3, %v744_v45 }
 0x306   : > { %1135 = shalt.err (!%p1132_p3)
}
 0x307   : > { %s1136_s25 = scalar_lea.hbm %s1413_s29, 128  ;;  %s1140_s18 = scalar_lea.hbm %s1494_s10, 256 }
 0x308   : > { %p1137_p4 = scmp.ne.s32.totalorder %s1413_s29, %s1136_s25  ;;  %p1141_p9 = scmp.lt.u32.totalorder %s1413_s29, %s1494_s10 }
 0x309   : > { %p1142_p10 = scmp.lt.u32.totalorder %s1140_s18, %s1136_s25  ;;  %p1144_p12 = scmp.lt.u32.totalorder %s1136_s25, %s1413_s29 }
 0x30a   : > { %p1138_p7 = pnand %p1137_p4, %p1316_p5 }
 0x30b   : > { %p1143_p11 = por %p1142_p10, %p1141_p9 }
 0x30c   : > { %p1139_p8 = pneg %p1138_p7 }
 0x30d   : > { %p1145_p13 = por %p1144_p12, %p1143_p11 }
 0x30f   : > { %p1146_p0 = pnand %p1145_p13, %p1139_p8 }
 0x311   : > { %1149 = shalt.err (!%p1146_p0)
}
 0x312   : > { %1072 = dma.vmem_to_hbm [thread:$0]  (%p1316_p5), %s853_s30, 128, %s1413_s29, %s826_s12  }
 0x313   : > { %s1501_s21 = sshll.u32 %s1400_s20, 3  ;;  %s1502_s28 = sshll.u32 %s1299_s17, 7 }
 0x314   : > { %s380_s11 = scalar_lea.vmem [#allocation2], %s1501_s21  ;;  %s1440_s18 = scalar_lea.hbm %s1493_s9, %s1502_s28 }
 0x315   : > { %s839_s27 = sshll.u32 %s380_s11, 4  ;;  %s821_s25 = scalar_lea.sflag [#allocation3], %s1400_s20  ;;  %s1442_s27 = int_to_ptr.vmem [resolvable:$true] %s839_s27 }
 0x316   : > { %s1150_s29 = scalar_lea.vmem %s1442_s27, 128  ;;  %s1222_s17 = smov [#allocation2]  }
 0x317   : > { %p1151_p1 = scmp.ne.s32.totalorder %s1442_s27, %s1150_s29  ;;  %s1154_s30 = sshll.u32 %s1222_s17, 4  ;;  %s1155_s30 = int_to_ptr.vmem [resolvable:$false] %s1154_s30 }
 0x318   : > { %s1156_s12 = scalar_lea.vmem %s1155_s30, 256  ;;  %p1157_p4 = scmp.lt.s32.totalorder %s1442_s27, %s1155_s30 }
 0x319   : > { %p1152_p2 = pnand %p1151_p1, %p1316_p5  ;;  %p1158_p7 = scmp.lt.s32.totalorder %s1156_s12, %s1150_s29 }
 0x31b   : > { %p1153_p3 = pneg %p1152_p2  ;;  %p1159_p8 = por %p1158_p7, %p1157_p4 }
 0x31d   : > { %p1160_p9 = pnand %p1159_p8, %p1153_p3 }
 0x3d8   : > { %v814_v46 = vpop.f32.mrb[4].mxu1 }
 0x3d9   : > { %818 = vst.msk [vmem:[%s380_s11] sm:$0xff] %vm656_vm2, %v814_v46  ;;  %v1052_v47 = vpop.f32.mrb[5].mxu1 }
 0x3da   : > { %1163 = shalt.err (!%p1160_p9)
}
 0x3db   : > { %s1164_s20 = scalar_lea.hbm %s1440_s18, 128  ;;  %s1168_s28 = scalar_lea.hbm %s1493_s9, 256 }
 0x3dc   : > { %p1165_p10 = scmp.ne.s32.totalorder %s1440_s18, %s1164_s20  ;;  %p1169_p13 = scmp.lt.u32.totalorder %s1440_s18, %s1493_s9 }
 0x3dd   : > { %p1170_p0 = scmp.lt.u32.totalorder %s1168_s28, %s1164_s20  ;;  %p1172_p2 = scmp.lt.u32.totalorder %s1164_s20, %s1440_s18 }
 0x3de   : > { %p1166_p11 = pnand %p1165_p10, %p1316_p5 }
 0x3df   : > { %p1171_p1 = por %p1170_p0, %p1169_p13 }
 0x3e0   : > { %p1167_p12 = pneg %p1166_p11 }
 0x3e1   : > { %p1173_p3 = por %p1172_p2, %p1171_p1 }
 0x3e3   : > { %p1174_p4 = pnand %p1173_p3, %p1167_p12 }
 0x3e5   : > { %1177 = shalt.err (!%p1174_p4)
}
 0x3e6   : > { %1071 = dma.vmem_to_hbm [thread:$0]  (%p1316_p5), %s1442_s27, 128, %s1440_s18, %s821_s25  }
 0x3e7 PF: > { %p1082_p7 = scmp.ge.s32.totalorder %s1216_s16, 2  ;;  %s864_s29 = sand.u32 1, %s1204_s13  }
 0x3e8   : > { %s865_s17 = scalar_lea.sflag [#allocation3], %s864_s29 }
 0x3e9   : > { %p1076_p8 = pnand %p1082_p7, %p1320_p6 }
 0x3eb   : > { %1195 = dma.done.wait (!%p1076_p8), %s865_s17, 128  }
 0x3ec   : > { %1197 = vsyncadd (!%p1076_p8), %s865_s17, 4294967168  ;;  %s874_s30 = scalar_lea.sflag [#allocation5], %s864_s29 }
 0x3ed   : > { %1199 = dma.done.wait (!%p1076_p8), %s874_s30, 128  }
 0x3ee   : > { %1201 = vsyncadd (!%p1076_p8), %s874_s30, 4294967168  ;;  %p24_p5 = scmp.ge.s32.totalorder %s1303_s19, 4   ;;  %s1503_s13 = smov %s1208_s14 }
 0x3ef   : > { %s1504_s14 = smov %s1212_s15  ;;  %s1505_s15 = smov %s1314_s22 }
 0x3f0   : > { %s1506_s16 = smov %s1303_s19  ;;  %26 = sbr.rel (!%p24_p5) target bundleno = 7 (0x7), region = 114 }
 0x3f7   :  { %879 = vsyncpa [#allocation3], 1 }
 0x3f8   :  { %881 = vsyncpa [#allocation3 + $0x1], 1 }
 0x3f9   :  { %882 = vsyncpa [#allocation5], 1 }
 0x3fa   :  { %884 = vsyncpa [#allocation5 + $0x1], 1 }

</bundles_post_ra>
